<compile_context>
chip_gen: v6e
topology: v6e:2x2x1
jax: 0.10.0
libtpu: 0.0.40
codegen_flags: <defaults>
</compile_context>

<pallas_src>
import functools

import jax
import jax.numpy as jnp
from jax.experimental import pallas as pl
from jax.experimental.pallas import tpu as pltpu

SEQ_LEN = 29      # fixed by the PyTorch module's `for i in range(0, 29)`
NUM_SPLITS = 2    # leading "parallel" grid axis -> one partial sum per TC on v7x


def _cdiv(a, b):
    return -(-a // b)


def _round_up(a, b):
    return _cdiv(a, b) * b


def _vmem_capacity_bytes():
    try:
        return int(pltpu.get_tpu_info().vmem_capacity_bytes)
    except Exception:
        return 64 * 1024 * 1024  # conservative fallback: v7x per-core VMEM


def _choose_batch_tile(batch, row_bytes):
    """Batch tile: largest multiple of 8 that keeps one x tile within ~1/5 of
    VMEM (double-buffered pipeline + residents stay well inside the scoped
    limit on every generation, incl. v7x's 64 MiB), capped so that there are
    at least ~2 blocks per core-split when the batch is large enough.  The
    tile does NOT need to divide the batch (cdiv grid + ragged last block)."""
    vmem_cap = _vmem_capacity_bytes()
    budget = min(16 * 1024 * 1024, vmem_cap // 5)          # ~12.8 MiB on v7x, 16 MiB v5e/v6e
    budget_rows = max(8, (budget // max(1, row_bytes)) // 8 * 8)
    want_rows = max(8, _round_up(_cdiv(batch, 2 * NUM_SPLITS), 8))
    return min(budget_rows, want_rows), vmem_cap


def _nll_sequence_loss_kernel(cls_ref, x_ref, tgt_ref, out_ref, acc_ref, *,
                              nblocks, guard):
    # cls_ref: (1, T*C)  int32   resident class-id row (one DMA, constant block)
    # x_ref:   (tb, T*C) native  log-prob tile (pipelined over batch)
    # tgt_ref: (tb, 1)   int32   targets, padded with -1 sentinel
    # out_ref: (1, T*C)  f32     per-core-split partial sums (written once)
    # acc_ref: (1, T*C)  f32     VMEM per-lane accumulator
    c = pl.program_id(0)
    s = pl.program_id(1)
    spc = pl.num_programs(1)

    @pl.when(s == 0)
    def _init():
        acc_ref[...] = jnp.zeros_like(acc_ref)

    def _accumulate():
        # mask[b, t*C + k] = (k == target[b]); sentinel (-1) rows and garbage
        # rows of a ragged last block never match -> contribute 0.
        mask = cls_ref[...] == tgt_ref[...]                 # (tb, T*C) bool
        picked = jnp.where(mask, x_ref[...], 0)             # native-dtype select
        # Per-lane partials only (no cross-lane reduce on the per-step path).
        acc_ref[...] += jnp.sum(picked.astype(jnp.float32), axis=0, keepdims=True)

    if guard:
        # Only emitted when the 2-way core split over-covers the block grid
        # (odd block count): the clamped duplicate block must not be counted.
        pl.when(c * spc + s < nblocks)(_accumulate)
    else:
        _accumulate()

    @pl.when(s == spc - 1)
    def _finalize():
        out_ref[...] = acc_ref[...]


def nll_sequence_loss(x, target):
    """x: (B, 29, C) log-probs (f32 or bf16); target: (B,) ints. Returns scalar f32."""
    B, T, C = x.shape
    assert T == SEQ_LEN, f"expected sequence length {SEQ_LEN}, got {T}"
    tc = T * C

    # Free contiguous reshape -> lane-dense (B, T*C) layout (29*C >> C lanes).
    # Intentionally NOT padded up to a multiple of 128: a wrapper pad would
    # materialize a full extra HBM copy of x.
    x_flat = x.reshape(B, tc)

    row_bytes = tc * x.dtype.itemsize
    tb, vmem_cap = _choose_batch_tile(B, row_bytes)

    # Tiny batches only: pad x up to one 8-row tile (cheap) so no block is
    # larger than the array.  Larger batches are never copied; the ragged last
    # block is handled by the -1 target sentinel + mask.
    if B < 8:
        x_flat = jnp.pad(x_flat, ((0, 8 - B), (0, 0)))

    nblocks = _cdiv(B, tb)                    # batch blocks actually backed by x
    spc = _cdiv(nblocks, NUM_SPLITS)          # grid steps per core-split
    guard = (NUM_SPLITS * spc != nblocks)     # odd block count -> skip duplicate

    # Targets padded to the block grid with -1 (never equals a class id).
    tgt = target.astype(jnp.int32).reshape(B)
    tgt2d = jnp.pad(tgt, (0, nblocks * tb - B), constant_values=-1).reshape(
        nblocks * tb, 1)

    # Per-flat-column class id: [0..C-1, 0..C-1, ...] repeated T times.
    class_row = jnp.tile(jnp.arange(C, dtype=jnp.int32), T).reshape(1, tc)

    def batch_block(c, s):
        # Clamp so the (rare) over-coverage step never indexes a block whose
        # start lies past the end of x; its contribution is masked off in-kernel.
        return (jnp.minimum(c * spc + s, nblocks - 1), 0)

    kernel = functools.partial(_nll_sequence_loss_kernel,
                               nblocks=nblocks, guard=guard)

    cost = pl.CostEstimate(
        flops=3 * B * tc,
        transcendentals=0,
        bytes_accessed=(B * tc * x.dtype.itemsize + nblocks * tb * 4
                        + tc * 4 + NUM_SPLITS * tc * 4),
    )

    partials = pl.pallas_call(
        kernel,
        out_shape=jax.ShapeDtypeStruct((NUM_SPLITS, 1, tc), jnp.float32),
        grid=(NUM_SPLITS, spc),
        in_specs=[
            # class-id row: constant block index -> stays resident.
            pl.BlockSpec((1, tc), lambda c, s: (0, 0)),
            # log-prob tile, native dtype, pipelined over batch blocks.
            pl.BlockSpec((tb, tc), batch_block),
            # per-row targets (sentinel-padded).
            pl.BlockSpec((tb, 1), batch_block),
        ],
        # One partial-sum block per core-split; leading dim squeezed in-kernel.
        out_specs=pl.BlockSpec((None, 1, tc), lambda c, s: (c, 0, 0)),
        scratch_shapes=[pltpu.VMEM((1, tc), jnp.float32)],
        compiler_params=pltpu.CompilerParams(
            dimension_semantics=("parallel", "arbitrary"),
            vmem_limit_bytes=min(vmem_cap * 3 // 4, 64 * 1024 * 1024),
        ),
        cost_estimate=cost,
    )(class_row, x_flat, tgt2d)

    return -jnp.sum(partials) / jnp.float32(B)


def _reference(x, target):
    # pure-JAX reference of the PyTorch loop
    B, T, C = x.shape
    picked = jnp.take_along_axis(
        x, target.reshape(B, 1, 1).astype(jnp.int32), axis=2)   # (B, T, 1)
    per_step = -jnp.mean(picked[:, :, 0], axis=0)                # (T,)
    return jnp.sum(per_step)


if __name__ == "__main__":
    key = jax.random.PRNGKey(0)
    B, T, C = 2, SEQ_LEN, 32

    k1, k2 = jax.random.split(key)
    logits = jax.random.normal(k1, (B, T, C), dtype=jnp.float32)
    logp = jax.nn.log_softmax(logits, axis=-1)   # module expects log-probs (NLLLoss)
    target = jax.random.randint(k2, (B,), 0, C, dtype=jnp.int32)

    loss = jax.block_until_ready(nll_sequence_loss(logp, target))
    ref = jax.block_until_ready(_reference(logp, target))
    assert jnp.allclose(loss, ref, rtol=1e-5, atol=1e-5), (loss, ref)

    print("KERNEL_OK")
</pallas_src>

<mosaic_0001>
module attributes {stable_mosaic.version = 11 : i64} {
  func.func @_nll_sequence_loss_kernel(%arg0: i32, %arg1: i32, %arg2: memref<1x928xi32, #tpu.memory_space<vmem>>, %arg3: memref<8x928xf32, #tpu.memory_space<vmem>>, %arg4: memref<8x1xi32, #tpu.memory_space<vmem>>, %arg5: memref<1x1x928xf32, #tpu.memory_space<vmem>>, %arg6: memref<1x928xf32, #tpu.memory_space<vmem>>) attributes {dimension_semantics = [#tpu.dimension_semantics<parallel>, #tpu.dimension_semantics<arbitrary>], iteration_bounds = array<i64: 2, 1>, scalar_prefetch = 0 : i64, scratch_operands = 1 : i64, tpu.core_type = #tpu.core_type<tc>, window_params = [{pipeline_mode = #tpu.pipeline_mode<synchronous>, transform_indices = @transform_0, window_bounds = array<i64: 1, 928>}, {transform_indices = @transform_1, window_bounds = array<i64: 8, 928>}, {transform_indices = @transform_2, window_bounds = array<i64: 8, 1>}, {transform_indices = @transform_3, window_bounds = array<i64: 1, 1, 928>}]} {
    %c0_i32 = arith.constant 0 : i32
    %0 = arith.cmpi eq, %arg1, %c0_i32 : i32
    %1 = arith.extui %0 : i1 to i32
    %c0_i32_0 = arith.constant 0 : i32
    %2 = arith.cmpi ne, %1, %c0_i32_0 : i32
    scf.if %2 {
      %cst = arith.constant 0.000000e+00 : f32
      %11 = vector.broadcast %cst : f32 to vector<1x928xf32>
      %c0 = arith.constant 0 : index
      %c0_5 = arith.constant 0 : index
      %12 = vector.load %arg6[%c0, %c0_5] : memref<1x928xf32, #tpu.memory_space<vmem>>, vector<1x928xf32>
      tpu.vector_store %arg6[%c0, %c0_5], %11 {strides = array<i32>} : memref<1x928xf32, #tpu.memory_space<vmem>>, vector<1x928xf32>,
    } else {
    }
    %c1_i32 = arith.constant 1 : i32
    %3 = arith.muli %arg0, %c1_i32 : i32
    %4 = arith.addi %3, %arg1 : i32
    %c1_i32_1 = arith.constant 1 : i32
    %5 = arith.cmpi slt, %4, %c1_i32_1 : i32
    %6 = arith.extui %5 : i1 to i32
    %c0_i32_2 = arith.constant 0 : i32
    %7 = arith.cmpi ne, %6, %c0_i32_2 : i32
    scf.if %7 {
      %c0 = arith.constant 0 : index
      %c0_5 = arith.constant 0 : index
      %11 = vector.load %arg2[%c0, %c0_5] : memref<1x928xi32, #tpu.memory_space<vmem>>, vector<1x928xi32>
      %c0_6 = arith.constant 0 : index
      %c0_7 = arith.constant 0 : index
      %12 = vector.load %arg4[%c0_6, %c0_7] : memref<8x1xi32, #tpu.memory_space<vmem>>, vector<8x1xi32>
      %13 = vector.broadcast %11 : vector<1x928xi32> to vector<8x928xi32>
      %14 = vector.broadcast %12 : vector<8x1xi32> to vector<8x928xi32>
      %15 = arith.cmpi eq, %13, %14 : vector<8x928xi32>
      %c0_8 = arith.constant 0 : index
      %c0_9 = arith.constant 0 : index
      %16 = vector.load %arg3[%c0_8, %c0_9] : memref<8x928xf32, #tpu.memory_space<vmem>>, vector<8x928xf32>
      %c0_i32_10 = arith.constant 0 : i32
      %17 = arith.sitofp %c0_i32_10 : i32 to f32
      %18 = vector.broadcast %17 : f32 to vector<8x928xf32>
      %19 = arith.select %15, %16, %18 : vector<8x928xi1>, vector<8x928xf32>
      %c0_11 = arith.constant 0 : index
      %c0_12 = arith.constant 0 : index
      %20 = vector.load %arg6[%c0_11, %c0_12] : memref<1x928xf32, #tpu.memory_space<vmem>>, vector<1x928xf32>
      %cst = arith.constant dense<0.000000e+00> : vector<928xf32>
      %21 = vector.multi_reduction <add>, %19, %cst [0] : vector<8x928xf32> to vector<928xf32>
      %22 = vector.shape_cast %21 : vector<928xf32> to vector<1x928xf32>
      %23 = arith.addf %20, %22 : vector<1x928xf32>
      %c0_13 = arith.constant 0 : index
      %c0_14 = arith.constant 0 : index
      %24 = vector.load %arg6[%c0_13, %c0_14] : memref<1x928xf32, #tpu.memory_space<vmem>>, vector<1x928xf32>
      tpu.vector_store %arg6[%c0_13, %c0_14], %23 {strides = array<i32>} : memref<1x928xf32, #tpu.memory_space<vmem>>, vector<1x928xf32>,
    } else {
    }
    %c0_i32_3 = arith.constant 0 : i32
    %8 = arith.cmpi eq, %arg1, %c0_i32_3 : i32
    %9 = arith.extui %8 : i1 to i32
    %c0_i32_4 = arith.constant 0 : i32
    %10 = arith.cmpi ne, %9, %c0_i32_4 : i32
    scf.if %10 {
      %c0 = arith.constant 0 : index
      %c0_5 = arith.constant 0 : index
      %11 = vector.load %arg6[%c0, %c0_5] : memref<1x928xf32, #tpu.memory_space<vmem>>, vector<1x928xf32>
      %c0_6 = arith.constant 0 : index
      %c0_7 = arith.constant 0 : index
      %c0_8 = arith.constant 0 : index
      %12 = vector.load %arg5[%c0_6, %c0_7, %c0_8] : memref<1x1x928xf32, #tpu.memory_space<vmem>>, vector<1x1x928xf32>
      %13 = vector.shape_cast %12 : vector<1x1x928xf32> to vector<1x928xf32>
      %14 = vector.shape_cast %11 : vector<1x928xf32> to vector<1x1x928xf32>
      tpu.vector_store %arg5[%c0_6, %c0_7, %c0_8], %14 {strides = array<i32>} : memref<1x1x928xf32, #tpu.memory_space<vmem>>, vector<1x1x928xf32>,
    } else {
    }
    return
  }
  func.func @transform_0(%arg0: i32, %arg1: i32) -> (i32, i32) {
    %c0_i32 = arith.constant 0 : i32
    %c0_i32_0 = arith.constant 0 : i32
    %c0_i32_1 = arith.constant 0 : i32
    return %c0_i32, %c0_i32_0 : i32, i32
  }
  func.func @transform_1(%arg0: i32, %arg1: i32) -> (i32, i32) {
    %c1_i32 = arith.constant 1 : i32
    %0 = arith.muli %arg0, %c1_i32 : i32
    %1 = arith.addi %0, %arg1 : i32
    %c0_i32 = arith.constant 0 : i32
    %2 = arith.minsi %1, %c0_i32 : i32
    %c0_i32_0 = arith.constant 0 : i32
    %c0_i32_1 = arith.constant 0 : i32
    return %2, %c0_i32_0 : i32, i32
  }
  func.func @transform_2(%arg0: i32, %arg1: i32) -> (i32, i32) {
    %c1_i32 = arith.constant 1 : i32
    %0 = arith.muli %arg0, %c1_i32 : i32
    %1 = arith.addi %0, %arg1 : i32
    %c0_i32 = arith.constant 0 : i32
    %2 = arith.minsi %1, %c0_i32 : i32
    %c0_i32_0 = arith.constant 0 : i32
    %c0_i32_1 = arith.constant 0 : i32
    return %2, %c0_i32_0 : i32, i32
  }
  func.func @transform_3(%arg0: i32, %arg1: i32) -> (i32, i32, i32) {
    %c0_i32 = arith.constant 0 : i32
    %c0_i32_0 = arith.constant 0 : i32
    %c0_i32_1 = arith.constant 0 : i32
    return %arg0, %c0_i32, %c0_i32_0 : i32, i32, i32
  }
}

</mosaic_0001>

<bundles_post_ra>
// kernel: tpu_custom_call.1
= control target key start
LH: loop header
LB: loop body
LE: loop exit
PB: predicated region body
PF: predicated region fallthrough
CT: control target
= control target key end

     0   :  { %8 = vsyncpa [#allocation4], 0  ;;  %s1019_s0 = inlined_call_operand.vmem [shape: s32[1,928], index: 0, kind: input, shape index: {}]   ;;  %s1020_s1 = inlined_call_operand.hbm [shape: f32[8,928], index: 1, kind: input, shape index: {}]   ;;  %s1021_s2 = inlined_call_operand.vmem [shape: s32[8,1], index: 2, kind: input, shape index: {}]   ;;  %s1022_s3 = inlined_call_operand.hbm [shape: f32[2,1,928], index: 3, kind: output, shape index: {}]  }
   0x1   :  { %10 = vsyncpa [#allocation4 + $0x1], 0 }
   0x2   :  { %11 = vsyncpa [#allocation5], 0 }
   0x3   :  { %13 = vsyncpa [#allocation5 + $0x1], 0  ;;  %s821_s12 = smov 0   ;;  %s823_s13 = smov 0  }
   0x4   :  { %s825_s14 = smov 0   ;;  %s827_s15 = smov 0  }
   0x5   :  { %s829_s16 = smov 0   ;;  %s831_s17 = smov 0  }
   0x6   :  { %s833_s18 = smov 0   ;;  %s835_s19 = smov 0  }
   0x7 LB: > { %s553_s20 = sadd.s32 4294967295, %s794_s19   ;;  %s554_s21 = sadd.s32 4294967294, %s794_s19   ;;  %s794_s19 = sphi %s835_s19, %s19_s19   ;;  %s790_s18 = sphi %s833_s18, %s1043_s18   ;;  %s786_s17 = sphi %s831_s17, %s1042_s17   ;;  %s782_s16 = sphi %s829_s16, %s1009_s16   ;;  %s778_s15 = sphi %s827_s15, %s1041_s15   ;;  %s774_s14 = sphi %s825_s14, %s1040_s14   ;;  %s770_s13 = sphi %s823_s13, %s1039_s13   ;;  %s766_s12 = sphi %s821_s12, %s1038_s12  }
   0x8   : > { %s31_s22 = sadd.s32 1, %s790_s18  ;;  %p763_p1 = scmp.ne.s32.totalorder %s782_s16, 0 }
   0x9   : > { %p33_p0 = scmp.ge.s32.totalorder %s31_s22, 2  ;;  %p73_p2 = scmp.eq.s32.totalorder %s794_s19, 0 }
   0xa   : > { %p78_p3 = scmp.ne.s32.totalorder %s782_s16, %s778_s15  ;;  %p79_p5 = scmp.eq.s32.totalorder %s553_s20, 0 }
   0xb   : > { %s1045_s22 = smov (%p33_p0, %s31_s22), 0  ;;  %p867_p4 = por %p763_p1, %p73_p2 }
   0xc   : > { %p871_p6 = por %p79_p5, %p78_p3  ;;  %s120_s25 = ssub.s32 %s790_s18, %s1045_s22 }
   0xd   : > { %p121_p7 = scmp.eq.s32.totalorder %s120_s25, 0  ;;  %s123_s26 = sadd.s32 1, %s774_s14 }
   0xe   : > { %s1026_s24 = scalar_select %p871_p6, 1, 0 }
   0xf   : > { %s879_s27 = scalar_select %p121_p7, %s774_s14, %s123_s26  }
  0x10   : > { %p133_p8 = scmp.ne.s32.totalorder %s774_s14, %s770_s13  ;;  %p134_p9 = scmp.eq.s32.totalorder %s553_s20, 1 }
  0x11   : > { %p139_p10 = scmp.ne.s32.totalorder %s770_s13, %s766_s12  ;;  %p140_p11 = scmp.eq.s32.totalorder %s554_s21, 1 }
  0x12   : > { %p885_p12 = por %p134_p9, %p133_p8  ;;  %p587_p1 = scmp.lt.s32.totalorder %s794_s19, 2 }
  0x13   : > { %p890_p0 = por %p140_p11, %p139_p10  ;;  %s796_s30 = smov [#allocation3]  }
  0x14   : > { %s1027_s28 = scalar_select %p885_p12, 1, 0 }
  0x15   : > { %s1028_s29 = scalar_select %p890_p0, 1, 0 }
  0x16   : > { %s178_s4 = sshll.u32 %s796_s30, 4  ;;  %p897_p2 = pnand %p587_p1, %p867_p4  ;;  %s179_s4 = int_to_ptr.vmem [resolvable:$true] %s178_s4 }
  0x17   : > { %s665_s8 = scalar_lea.hbm %s1020_s1, 1024 }
  0x18   : > { %p666_p7 = scmp.ne.s32.totalorder %s1020_s1, %s665_s8  ;;  %p667_p8 = pneg %p897_p2 }
  0x19   : > { %p672_p4 = scmp.lt.s32.totalorder %s665_s8, %s665_s8 }
  0x1a   : > { %p668_p9 = pnand %p667_p8, %p666_p7 }
  0x1c   : > { %p669_p10 = pneg %p668_p9 }
  0x1e   : > { %p674_p11 = pnand %p672_p4, %p669_p10 }
  0x20   : > { %677 = shalt.err (!%p674_p11)
}
  0x21   : > { %s678_s11 = scalar_lea.vmem %s179_s4, 1024  ;;  %s685_s15 = scalar_lea.vmem %s179_s4, 2048 }
  0x22   : > { %p679_p1 = scmp.ne.s32.totalorder %s179_s4, %s678_s11  ;;  %p686_p5 = scmp.lt.s32.totalorder %s179_s4, %s179_s4 }
  0x23   : > { %p687_p0 = scmp.lt.s32.totalorder %s685_s15, %s678_s11 }
  0x24   : > { %p681_p13 = pnand %p679_p1, %p667_p8 }
  0x25   : > { %p688_p12 = por %p687_p0, %p686_p5 }
  0x26   : > { %p682_p3 = pneg %p681_p13 }
  0x28   : > { %p689_p6 = pnand %p688_p12, %p682_p3 }
  0x2a   : > { %692 = shalt.err (!%p689_p6)
}
  0x2b   : > { %582 = dma.hbm_to_vmem [thread:$0]  (!%p897_p2), %s1020_s1, 1024, %s179_s4, [#allocation4]  }
  0x2c   : > { %p1030_p7 = scmp.lt.s32.totalorder %s794_s19, 3  ;;  %p1031_p9 = scmp.ge.s32.totalorder %s794_s19, 1 }
  0x2e   : > { %p197_p10 = pnand %p1031_p9, %p1030_p7 }
  0x2f   : > { %s202_s23 = sand.u32 (!%p197_p10), 1, %s782_s16   ;;  %p1032_p6 = scmp.ne.s32.totalorder (!%p197_p10), %s1026_s24, 0 }
  0x30   : > { %200 = sbr.rel (%p197_p10) target bundleno = 244 (0xf4), region = 32  ;;  %s561_s25 = sshll.u32 (!%p197_p10), %s202_s23, 6 }
  0x31   : > { %s203_s26 = scalar_lea.sflag (!%p197_p10), [#allocation4], %s202_s23  ;;  %s921_s30 = scalar_lea.vmem (!%p197_p10), [#allocation3], %s561_s25 }
  0x35   : > { %756 = dma.done.wait (%p1032_p6), %s203_s26, 1024  }
  0x36   : > { %758 = vsyncadd (%p1032_p6), %s203_s26, 4294966272  ;;  %s233_s4 = sand.u32 1, %s770_s13   ;;  %p240_p12 = scmp.lt.s32.totalorder %s786_s17, 0  ;;  %v253_v0 = vlaneseq  ;;  %v797_v2 = vmov 0.0  }
  0x37   : > { %s931_s5 = sshll.u32 %s233_s4, 3  ;;  %p567_p13 = scmp.ge.s32.totalorder %s786_s17, 1 }
  0x38   : > { %vm933_vm0 = vcmp.lt.s32.totalorder %v253_v0, 928  ;;  %s241_s6 = scalar_select %p240_p12, %s786_s17, 0 }
  0x39   : > { %257 = vst.msk [vmem:[#allocation2] sm:$0xff] %vm933_vm0, %v797_v2  ;;  %s235_s10 = scalar_lea.vmem [#allocation6], %s931_s5  ;;  %262 = sbr.rel (%p567_p13) target bundleno = 220 (0xdc), region = 44 }
  0x3a   : > { %s1047_s6 = smov (!%p240_p12, %s241_s6), 0 }
  0x3b   : > { %s566_s24 = sshll.u32 %s1047_s6, 3 }
  0x3c   : > { %s245_s9 = scalar_lea.vmem %s1021_s2, %s566_s24 }
  0x3e   : > { %v264_v3 = vld [vmem:[%s245_s9] sm:$0xff]  ;;  %v798_v4 = vmov 0   ;;  %v266_v5 = vshrl.u32 %v253_v0, 7  ;;  %v799_v6 = vmov 1966171168   ;;  %v308_v26 = vld [vmem:[%s921_s30] sm:$0xff] }
  0x3f   : > { %664 = vset.pattern.permute.xlu0 %v798_v4  ;;  %v388_v7 = vunpack.c.l.s4 %v799_v6  ;;  %v263_v16 = vld [vmem:[%s1019_s0] sm:$0xff]  ;;  %v309_v27 = vld [vmem:[%s921_s30 + $0x8] sm:$0xff]  ;;  %v310_v28 = vld [vmem:[%s921_s30 + $0x10] sm:$0xff]  ;;  %vm367_vm1 = vcmask 261120  }
  0x40   : > { %298 = vperm.xlu0 %664, %v264_v3   ;;  %v267_v8 = vsub.s32 0, %v266_v5  ;;  %v271_v9 = vsub.s32 1, %v266_v5  ;;  %v275_v10 = vsub.s32 2, %v266_v5  ;;  %v279_v11 = vsub.s32 3, %v266_v5  ;;  %v311_v29 = vld [vmem:[%s921_s30 + $0x18] sm:$0xff]  ;;  %v312_v30 = vld [vmem:[%s921_s30 + $0x20] sm:$0xff] }
  0x41   : > { %v283_v12 = vsub.s32 4, %v266_v5  ;;  %v287_v13 = vsub.s32 5, %v266_v5  ;;  %v291_v14 = vsub.s32 6, %v266_v5  ;;  %v295_v15 = vsub.s32 7, %v266_v5  ;;  %v313_v33 = vld [vmem:[%s921_s30 + $0x28] sm:$0xff]  ;;  %v314_v34 = vld [vmem:[%s921_s30 + $0x30] sm:$0xff] }
  0x42   : > { %v389_v17 = vunpack.c.0.s8 %v388_v7  ;;  %v268_v18 = vrot.slane %v263_v16, %v267_v8  ;;  %v272_v19 = vrot.slane %v263_v16, %v271_v9  ;;  %v276_v20 = vrot.slane %v263_v16, %v275_v10  ;;  %v315_v35 = vld [vmem:[%s921_s30 + $0x38] sm:$0xff] }
  0x43   : > { %v280_v21 = vrot.slane %v263_v16, %v279_v11  ;;  %v284_v22 = vrot.slane %v263_v16, %v283_v12  ;;  %v288_v23 = vrot.slane %v263_v16, %v287_v13  ;;  %v292_v24 = vrot.slane %v263_v16, %v291_v14 }
  0x44   : > { %v296_v25 = vrot.slane %v263_v16, %v295_v15  ;;  %v953_v31 = vsub.s32 %v389_v17, %v266_v5 }
  0xbb   : > { %v299_v32 = vpop.permute.xlu0 %298 }
  0xbc   : > { %vm300_vm2 = vcmp.eq.s32.totalorder %v268_v18, %v299_v32  ;;  %vm301_vm3 = vcmp.eq.s32.totalorder %v272_v19, %v299_v32  ;;  %vm302_vm4 = vcmp.eq.s32.totalorder %v276_v20, %v299_v32  ;;  %vm303_vm5 = vcmp.eq.s32.totalorder %v280_v21, %v299_v32 }
  0xbd   : > { %vm304_vm6 = vcmp.eq.s32.totalorder %v284_v22, %v299_v32  ;;  %vm305_vm7 = vcmp.eq.s32.totalorder %v288_v23, %v299_v32  ;;  %vm306_vm8 = vcmp.eq.s32.totalorder %v292_v24, %v299_v32  ;;  %vm307_vm9 = vcmp.eq.s32.totalorder %v296_v25, %v299_v32 }
  0xbe   : > { %v316_v36 = vsel %vm300_vm2, %v308_v26, 0.0  ;;  %v317_v37 = vsel %vm301_vm3, %v309_v27, 0.0  ;;  %v318_v38 = vsel %vm302_vm4, %v310_v28, 0.0  ;;  %v319_v39 = vsel %vm303_vm5, %v311_v29, 0.0 }
  0xbf   : > { %v320_v40 = vsel %vm304_vm6, %v312_v30, 0.0  ;;  %v321_v41 = vsel %vm305_vm7, %v313_v33, 0.0  ;;  %v322_v42 = vsel %vm306_vm8, %v314_v34, 0.0  ;;  %v323_v43 = vsel %vm307_vm9, %v315_v35, 0.0 }
  0xc0   : > { %v325_v44 = vrot.slane %v316_v36, 4  ;;  %v331_v45 = vrot.slane %v317_v37, 4  ;;  %v337_v46 = vrot.slane %v318_v38, 4  ;;  %v343_v47 = vrot.slane %v319_v39, 4 }
  0xc1   : > { %v349_v48 = vrot.slane %v320_v40, 4  ;;  %v355_v49 = vrot.slane %v321_v41, 4  ;;  %v361_v50 = vrot.slane %v322_v42, 4  ;;  %v368_v51 = vsel %vm367_vm1, %v323_v43, 0.0  ;;  %v324_v43 = vld [vmem:[#allocation2] sm:$0xff] }
  0xc2   : > { %v326_v52 = vadd.f32 %v325_v44, %v316_v36  ;;  %v332_v53 = vadd.f32 %v331_v45, %v317_v37  ;;  %v338_v54 = vadd.f32 %v337_v46, %v318_v38  ;;  %v344_v55 = vadd.f32 %v343_v47, %v319_v39 }
  0xc3   : > { %v350_v56 = vadd.f32 %v349_v48, %v320_v40  ;;  %v356_v57 = vadd.f32 %v355_v49, %v321_v41  ;;  %v362_v58 = vadd.f32 %v361_v50, %v322_v42  ;;  %v369_v59 = vrot.slane %v368_v51, 4 }
  0xc4   : > { %v327_v60 = vrot.slane %v326_v52, 2  ;;  %v333_v61 = vrot.slane %v332_v53, 2  ;;  %v339_v62 = vrot.slane %v338_v54, 2  ;;  %v345_v63 = vrot.slane %v344_v55, 2 }
  0xc5   : > { %v351_v0 = vrot.slane %v350_v56, 2  ;;  %v357_v2 = vrot.slane %v356_v57, 2  ;;  %v363_v3 = vrot.slane %v362_v58, 2  ;;  %v370_v4 = vadd.f32 %v369_v59, %v368_v51 }
  0xc6   : > { %v328_v5 = vadd.f32 %v327_v60, %v326_v52  ;;  %v334_v6 = vadd.f32 %v333_v61, %v332_v53  ;;  %v340_v7 = vadd.f32 %v339_v62, %v338_v54  ;;  %v346_v8 = vadd.f32 %v345_v63, %v344_v55 }
  0xc7   : > { %v352_v9 = vadd.f32 %v351_v0, %v350_v56  ;;  %v358_v10 = vadd.f32 %v357_v2, %v356_v57  ;;  %v364_v11 = vadd.f32 %v363_v3, %v362_v58  ;;  %v371_v12 = vrot.slane %v370_v4, 2 }
  0xc8   : > { %v329_v13 = vrot.slane %v328_v5, 1  ;;  %v335_v14 = vrot.slane %v334_v6, 1  ;;  %v341_v15 = vrot.slane %v340_v7, 1  ;;  %v347_v16 = vrot.slane %v346_v8, 1 }
  0xc9   : > { %v353_v17 = vrot.slane %v352_v9, 1  ;;  %v359_v18 = vrot.slane %v358_v10, 1  ;;  %v365_v19 = vrot.slane %v364_v11, 1  ;;  %v372_v20 = vadd.f32 %v371_v12, %v370_v4 }
  0xca   : > { %v330_v21 = vadd.f32 %v329_v13, %v328_v5  ;;  %v336_v22 = vadd.f32 %v335_v14, %v334_v6  ;;  %v342_v23 = vadd.f32 %v341_v15, %v340_v7  ;;  %v348_v24 = vadd.f32 %v347_v16, %v346_v8 }
  0xcb   : > { %v354_v25 = vadd.f32 %v353_v17, %v352_v9  ;;  %v360_v26 = vadd.f32 %v359_v18, %v358_v10  ;;  %v366_v27 = vadd.f32 %v365_v19, %v364_v11  ;;  %v373_v28 = vrot.slane %v372_v20, 1 }
  0xcc   : > { %v383_v29 = vcombine.low %v330_v21, %v336_v22  ;;  %v384_v30 = vcombine.low %v342_v23, %v348_v24 }
  0xcd   : > { %v374_v32 = vadd.f32 %v373_v28, %v372_v20  ;;  %v385_v33 = vcombine.low %v354_v25, %v360_v26 }
  0xce   : > { %v393_v34 = vrot.slane %v383_v29, %v953_v31  ;;  %v400_v35 = vrot.slane %v384_v30, %v953_v31 }
  0xcf   : > { %v386_v36 = vcombine.low %v366_v27, %v374_v32  ;;  %v407_v37 = vrot.slane %v385_v33, %v953_v31 }
  0xd0   : > { %v415_v38 = vcombine.low %v393_v34, %v400_v35 }
  0xd1   : > { %v414_v39 = vrot.slane %v386_v36, %v953_v31 }
  0xd2   : > { %v423_v41 = vrot.slane %v415_v38, %v953_v31 }
  0xd3   : > { %v416_v40 = vcombine.low %v407_v37, %v414_v39 }
  0xd5   : > { %v430_v42 = vrot.slane %v416_v40, %v953_v31 }
  0xd7   : > { %v431_v44 = vcombine.low %v423_v41, %v430_v42 }
  0xd9   : > { %v433_v45 = vadd.f32 %v431_v44, %v324_v43 }
  0xdb   : > { %438 = vst.msk [vmem:[#allocation2] sm:$0xff] %vm933_vm0, %v433_v45 }
  0xdc PF: > { %s574_s20 = sshll.u32 %s786_s17, 7  ;;  %s463_s26 = sshll.u32 %s235_s10, 4  ;;  %s464_s26 = int_to_ptr.vmem [resolvable:$true] %s463_s26 }
  0xdd   : > { %s461_s25 = scalar_lea.hbm %s1022_s3, %s574_s20  ;;  %s449_s30 = scalar_lea.sflag [#allocation5], %s233_s4 }
  0xde   : > { %s693_s6 = scalar_lea.vmem %s464_s26, 128  ;;  %p1035_p2 = scmp.ne.s32.totalorder %s1027_s28, 0 }
  0xdf   : > { %p694_p0 = scmp.ne.s32.totalorder %s464_s26, %s693_s6  ;;  %s800_s24 = smov [#allocation6]  }
  0xe0   : > { %s697_s17 = sshll.u32 %s800_s24, 4  ;;  %s698_s17 = int_to_ptr.vmem [resolvable:$false] %s697_s17 }
  0xe1   : > { %p695_p3 = pnand %p694_p0, %p1035_p2  ;;  %s699_s7 = scalar_lea.vmem %s698_s17, 256 }
  0xe2   : > { %v442_v46 = vld [vmem:[#allocation2] sm:$0xff]  ;;  %p700_p8 = scmp.lt.s32.totalorder %s464_s26, %s698_s17  ;;  %p701_p4 = scmp.lt.s32.totalorder %s699_s7, %s693_s6 }
  0xe3   : > { %447 = vst.msk [vmem:[%s235_s10] sm:$0xff] %vm933_vm0, %v442_v46  ;;  %p696_p5 = pneg %p695_p3 }
  0xe4   : > { %p702_p11 = por %p701_p4, %p700_p8 }
  0xe6   : > { %p703_p1 = pnand %p702_p11, %p696_p5 }
  0xe8   : > { %706 = shalt.err (!%p703_p1)
}
  0xe9   : > { %s707_s8 = scalar_lea.hbm %s461_s25, 128  ;;  %s711_s9 = scalar_lea.hbm %s1022_s3, 256 }
  0xea   : > { %p708_p7 = scmp.ne.s32.totalorder %s461_s25, %s707_s8  ;;  %p712_p6 = scmp.lt.s32.totalorder %s461_s25, %s1022_s3 }
  0xeb   : > { %p713_p12 = scmp.lt.s32.totalorder %s711_s9, %s707_s8 }
  0xec   : > { %p709_p9 = pnand %p708_p7, %p1035_p2 }
  0xed   : > { %p714_p13 = por %p713_p12, %p712_p6 }
  0xee   : > { %p710_p10 = pneg %p709_p9 }
  0xf0   : > { %p715_p0 = pnand %p714_p13, %p710_p10 }
  0xf2   : > { %718 = shalt.err (!%p715_p0)
}
  0xf3   : > { %577 = dma.vmem_to_hbm [thread:$0]  (%p1035_p2), %s464_s26, 128, %s461_s25, %s449_s30  }
  0xf4 PF: > { %s475_s15 = sand.u32 1, %s766_s12   ;;  %p1036_p3 = scmp.ne.s32.totalorder %s1028_s29, 0 }
  0xf5   : > { %p1037_p5 = scmp.ge.s32.totalorder %s794_s19, 2  ;;  %s476_s20 = scalar_lea.sflag [#allocation5], %s475_s15 }
  0xf7   : > { %p584_p8 = pnand %p1037_p5, %p1036_p3 }
  0xf9   : > { %p585_p4 = pneg %p584_p8 }
  0xfb   : > { %760 = dma.done.wait (%p585_p4), %s476_s20, 128  }
  0xfc   : > { %762 = vsyncadd (%p585_p4), %s476_s20, 4294967168  ;;  %s19_s19 = sadd.s32 1, %s794_s19   ;;  %s1038_s12 = smov %s770_s13 }
  0xfd   : > { %p16_p11 = scmp.ge.s32.totalorder %s19_s19, 4   ;;  %s1039_s13 = smov %s774_s14 }
  0xfe   : > { %s1040_s14 = smov %s879_s27  ;;  %s1041_s15 = smov %s782_s16 }
  0xff   : > { %s1009_s16 = smov 0   ;;  %s1042_s17 = smov %s790_s18 }
 0x100   : > { %s1043_s18 = smov %s1045_s22  ;;  %18 = sbr.rel (!%p16_p11) target bundleno = 7 (0x7), region = 92 }
 0x105   :  { %481 = vsyncpa [#allocation4], 1 }
 0x106   :  { %483 = vsyncpa [#allocation4 + $0x1], 1 }
 0x107   :  { %484 = vsyncpa [#allocation5], 1 }
 0x108   :  { %486 = vsyncpa [#allocation5 + $0x1], 1 }

</bundles_post_ra>
